<compile_context>
chip_gen: v7x
topology: tpu7x:2x2x1
jax: 0.10.0
libtpu: 0.0.40
codegen_flags: <defaults>
</compile_context>

<pallas_src>
import numpy as np
import jax
import jax.numpy as jnp
from jax.experimental import pallas as pl
from jax.experimental.pallas import tpu as pltpu

DOF = 3             # dofs per node (3-D elasticity)
NPE = 8             # nodes per H8 element
EDOF = NPE * DOF    # 24
DPAD = 8            # dof rows padded 3 -> 8 inside the assembly kernel (MXU M)


# ----------------------------------------------------------------------------
# Kernel 1: per-type element stiffness matmul  Fe_T = K_t @ Ue_T   (MXU)
# ----------------------------------------------------------------------------
def _elem_matmul_kernel(tile_type_ref, k_ref, ue_ref, fe_ref):
    # k_ref : (1, 24, 24) stiffness of this tile's element type (selected by the
    #         scalar-prefetch index_map; same-type consecutive tiles reuse it).
    # ue_ref/fe_ref : (24, TE) lane-dense element slabs.
    del tile_type_ref
    fe_ref[...] = jnp.dot(k_ref[0], ue_ref[...],
                          preferred_element_type=jnp.float32)


def element_matmul(tile_types, filters, Ue_T, *, te):
    n_tiles = int(tile_types.shape[0])
    E_pad = Ue_T.shape[1]
    return pl.pallas_call(
        _elem_matmul_kernel,
        out_shape=jax.ShapeDtypeStruct((EDOF, E_pad), jnp.float32),
        grid_spec=pltpu.PrefetchScalarGridSpec(
            num_scalar_prefetch=1,
            grid=(n_tiles,),
            in_specs=[
                pl.BlockSpec((1, EDOF, EDOF), lambda i, tt: (tt[i], 0, 0)),
                pl.BlockSpec((EDOF, te), lambda i, tt: (0, i)),
            ],
            out_specs=pl.BlockSpec((EDOF, te), lambda i, tt: (0, i)),
        ),
        compiler_params=pltpu.CompilerParams(
            dimension_semantics=("parallel",)),
    )(tile_types, filters, Ue_T)


# ----------------------------------------------------------------------------
# Kernel 2: sorted scatter-add assembly.
#   Output KU_T (8, N_pad) is tiled over nodes (grid axis 0, parallel); for each
#   node tile we only visit the contribution tiles that intersect its contiguous
#   sorted range (grid axis 1, arbitrary; skip table via scalar prefetch) and
#   scatter them with an on-chip one-hot matmul (8,TK)@(TK,TN).
# ----------------------------------------------------------------------------
def _assemble_kernel(ktbl_ref, kcnt_ref, idx_ref, fe_ref, o_ref, fe8_ref):
    del ktbl_ref
    i = pl.program_id(0)
    j = pl.program_id(1)

    @pl.when(j == 0)
    def _():
        o_ref[...] = jnp.zeros_like(o_ref)
        fe8_ref[...] = jnp.zeros_like(fe8_ref)   # rows DOF..DPAD stay zero

    @pl.when(j < kcnt_ref[i])
    def _():
        tk = fe_ref.shape[1]
        tn = o_ref.shape[1]
        fe8_ref[0:DOF, :] = fe_ref[...]          # 3 dof rows, padded to 8 in VMEM
        cols = i * tn + jax.lax.broadcasted_iota(jnp.int32, (tk, tn), 1)
        onehot = (idx_ref[...] == cols).astype(jnp.float32)      # (TK, TN)
        o_ref[...] += jnp.dot(fe8_ref[...], onehot,
                              preferred_element_type=jnp.float32)


def assemble(ktbl, kcnt, sorted_nodes, sorted_vals_T, *,
             n_node_tiles, kmax, tn, tk):
    return pl.pallas_call(
        _assemble_kernel,
        out_shape=jax.ShapeDtypeStruct((DPAD, n_node_tiles * tn), jnp.float32),
        grid_spec=pltpu.PrefetchScalarGridSpec(
            num_scalar_prefetch=2,
            grid=(n_node_tiles, kmax),
            in_specs=[
                pl.BlockSpec((tk, 1),
                             lambda i, j, kt, kc: (kt[i * kmax + j], 0)),
                pl.BlockSpec((DOF, tk),
                             lambda i, j, kt, kc: (0, kt[i * kmax + j])),
            ],
            out_specs=pl.BlockSpec((DPAD, tn),
                                   lambda i, j, kt, kc: (0, i)),
            scratch_shapes=[pltpu.VMEM((DPAD, tk), jnp.float32)],
        ),
        compiler_params=pltpu.CompilerParams(
            dimension_semantics=("parallel", "arbitrary")),
    )(ktbl, kcnt, sorted_nodes, sorted_vals_T)


# ----------------------------------------------------------------------------
# Host-side mesh planning (topology is static; under jit this would be computed
# once per mesh and reused across solver iterations).
# ----------------------------------------------------------------------------
def _plan_elements(types_np, n_types, te):
    order = np.argsort(types_np, kind="stable")
    counts = np.bincount(types_np, minlength=n_types)
    perm_chunks, tile_types = [], []
    start = 0
    for t in range(n_types):
        c = int(counts[t])
        if c == 0:
            continue
        n_tiles = -(-c // te)
        pad = n_tiles * te - c
        perm_chunks.append(np.concatenate(
            [order[start:start + c], np.full((pad,), -1, dtype=np.int64)]))
        tile_types += [t] * n_tiles
        start += c
    perm = np.concatenate(perm_chunks).astype(np.int32)     # (E_pad,)
    return perm, np.asarray(tile_types, dtype=np.int32)


def _plan_assembly(node_flat, n_nodes, tn, tk):
    C = node_flat.shape[0]
    C_pad = -(-C // tk) * tk
    n_node_tiles = -(-n_nodes // tn)
    sentinel = n_node_tiles * tn                 # == N_pad, never matched
    nodes_pad = np.concatenate(
        [node_flat, np.full((C_pad - C,), sentinel, dtype=np.int64)])
    order_c = np.argsort(nodes_pad, kind="stable")
    sorted_nodes = nodes_pad[order_c]

    ranges = []
    for i in range(n_node_tiles):
        lo = int(np.searchsorted(sorted_nodes, i * tn, side="left"))
        hi = int(np.searchsorted(sorted_nodes, (i + 1) * tn, side="left"))
        if hi > lo:
            lo_t = lo // tk
            cnt = -(-hi // tk) - lo_t
        else:
            lo_t, cnt = 0, 0
        ranges.append((lo_t, cnt))
    kmax = max(1, max(c for _, c in ranges))
    ktbl = np.zeros((n_node_tiles, kmax), dtype=np.int32)
    kcnt = np.zeros((n_node_tiles,), dtype=np.int32)
    for i, (lo_t, cnt) in enumerate(ranges):
        kcnt[i] = cnt
        if cnt > 0:
            ktbl[i, :cnt] = lo_t + np.arange(cnt, dtype=np.int32)
            # Padding entries repeat the last valid tile index so masked-off
            # grid steps keep the same block index -> Pallas skips the DMA.
            ktbl[i, cnt:] = lo_t + cnt - 1
    return (order_c.astype(np.int32), sorted_nodes.astype(np.int32),
            ktbl.reshape(-1), kcnt, n_node_tiles, kmax, C_pad)


# ----------------------------------------------------------------------------
# FECONV.forward
# ----------------------------------------------------------------------------
def feconv_forward(U, H8types, nodIdx, filters, *, te=512, tn=128, tk=128):
    """KU = sum_e P_e^T ( K_{type(e)} @ (P_e U) )."""
    N, dof = U.shape
    E, npe = nodIdx.shape
    T = filters.shape[0]
    assert dof == DOF and npe == NPE and filters.shape[1:] == (EDOF, EDOF)
    assert te % 128 == 0 and tn % 128 == 0 and tk % 128 == 0

    # Host-side planning from the static mesh topology.
    types_np = np.asarray(jax.device_get(H8types)).astype(np.int64)
    nod_np = np.asarray(jax.device_get(nodIdx)).astype(np.int64)

    perm, tile_types = _plan_elements(types_np, T, te)
    E_pad = perm.shape[0]

    n_node_tiles = -(-N // tn)
    sentinel = n_node_tiles * tn                 # dummy node for padded elements
    gathered = nod_np[np.maximum(perm, 0)]       # (E_pad, 8)
    gathered[perm < 0] = sentinel
    node_flat = gathered.T.reshape(-1)           # contribution c = a*E_pad + e

    (order_c, sorted_nodes, ktbl, kcnt,
     n_node_tiles, kmax, C_pad) = _plan_assembly(node_flat, N, tn, tk)

    # d-major row permutation of the stiffness matrices: row d*8+a <- 3a+d.
    # Makes kernel 1's output directly reshapeable to the per-contribution
    # (3, 8*E_pad) layout (pure row-major view, no device transpose).
    row_perm = np.asarray([a * DOF + d for d in range(DOF) for a in range(NPE)],
                          dtype=np.int32)
    filters_perm = filters.astype(jnp.float32)[:, jnp.asarray(row_perm), :]

    # Device-side gathers / layout (plain JAX glue; only O(E) sized data).
    perm_j = jnp.asarray(perm)
    valid = perm_j >= 0
    Ue = U[nodIdx[jnp.maximum(perm_j, 0)]].reshape(E_pad, EDOF)
    Ue = jnp.where(valid[:, None], Ue, 0.0)
    Ue_T = Ue.T.astype(jnp.float32)                                  # (24, E_pad)

    # Hot path 1 (Pallas): per-type MXU element stiffness matmul.
    Fe_T = element_matmul(jnp.asarray(tile_types),
                          filters_perm, Ue_T, te=te)                 # (24, E_pad)

    # (24, E_pad) -> (3, 8*E_pad): free row-major view thanks to the filter row
    # permutation; column index = a*E_pad + e matches node_flat ordering.
    vals_T = Fe_T.reshape(DOF, NPE * E_pad)
    vals_T = jnp.pad(vals_T, ((0, 0), (0, C_pad - NPE * E_pad)))
    # TODO(synk): fuse this sorted column gather + the assembly with kernel 1 in
    # a single pallas_call (manual DMA gather) to avoid the Fe HBM round-trip.
    sorted_vals_T = vals_T[:, jnp.asarray(order_c)]                  # (3, C_pad)
    sorted_nodes_2d = jnp.asarray(sorted_nodes).reshape(C_pad, 1)

    # Hot path 2 (Pallas): sorted scatter-add assembly, lane-dense (8, N_pad).
    KU_T = assemble(jnp.asarray(ktbl), jnp.asarray(kcnt),
                    sorted_nodes_2d, sorted_vals_T,
                    n_node_tiles=n_node_tiles, kmax=kmax, tn=tn, tk=tk)
    return KU_T[:DOF, :N].T                                          # (N, 3)


if __name__ == "__main__":
    key = jax.random.PRNGKey(0)
    k_u, k_t, k_n, k_f = jax.random.split(key, 4)

    N_NODES = 64      # small synthetic mesh
    N_ELEM = 32
    N_TYPES = 4

    U = jax.random.normal(k_u, (N_NODES, DOF), dtype=jnp.float32)
    H8types = jax.random.randint(k_t, (N_ELEM,), 0, N_TYPES, dtype=jnp.int32)
    nodIdx = jax.random.randint(k_n, (N_ELEM, NPE), 0, N_NODES, dtype=jnp.int32)
    filters = jax.random.normal(k_f, (N_TYPES, EDOF, EDOF), dtype=jnp.float32)
    filters = 0.5 * (filters + jnp.swapaxes(filters, 1, 2))   # symmetric Ke

    # Small demo tiles; on real meshes use te=512..2048 and tn/tk=256+.
    KU = feconv_forward(U, H8types, nodIdx, filters, te=128, tn=128, tk=128)
    KU = jax.block_until_ready(KU)

    # Pure-JAX reference for sanity.
    Fe_ref = jnp.einsum("eij,ej->ei", filters[H8types],
                        U[nodIdx].reshape(N_ELEM, EDOF))
    KU_ref = jnp.zeros((N_NODES, DOF), jnp.float32).at[
        nodIdx.reshape(-1)].add(Fe_ref.reshape(N_ELEM * NPE, DOF))

    if not jnp.allclose(KU, KU_ref, atol=1e-4, rtol=1e-4):
        raise AssertionError("Pallas FECONV does not match reference")

    print("KERNEL_OK")
</pallas_src>

<mosaic_0001>
module attributes {stable_mosaic.version = 11 : i64} {
  func.func @_elem_matmul_kernel(%arg0: i32, %arg1: memref<4xi32, #tpu.memory_space<smem>>, %arg2: memref<1x24x24xf32, #tpu.memory_space<vmem>>, %arg3: memref<24x128xf32, #tpu.memory_space<vmem>>, %arg4: memref<24x128xf32, #tpu.memory_space<vmem>>) attributes {dimension_semantics = [#tpu.dimension_semantics<parallel>], iteration_bounds = array<i64: 4>, scalar_prefetch = 1 : i64, scratch_operands = 0 : i64, tpu.core_type = #tpu.core_type<tc>, window_params = [{transform_indices = @transform_0, window_bounds = array<i64: 1, 24, 24>}, {transform_indices = @transform_1, window_bounds = array<i64: 24, 128>}, {transform_indices = @transform_2, window_bounds = array<i64: 24, 128>}]} {
    %c0 = arith.constant 0 : index
    %c0_0 = arith.constant 0 : index
    %c0_1 = arith.constant 0 : index
    %0 = vector.load %arg2[%c0, %c0_0, %c0_1] : memref<1x24x24xf32, #tpu.memory_space<vmem>>, vector<1x24x24xf32>
    %1 = vector.shape_cast %0 : vector<1x24x24xf32> to vector<24x24xf32>
    %c0_2 = arith.constant 0 : index
    %c0_3 = arith.constant 0 : index
    %2 = vector.load %arg3[%c0_2, %c0_3] : memref<24x128xf32, #tpu.memory_space<vmem>>, vector<24x128xf32>
    %cst = arith.constant dense<0.000000e+00> : vector<24x128xf32>
    %3 = tpu.matmul %1, %2, %cst {dimension_numbers = #tpu.dot_dimension_numbers<[1], [0], [0], [1], [0, 0, 1, 1], [], []>} : vector<24x24xf32>, vector<24x128xf32>, vector<24x128xf32> -> vector<24x128xf32>
    %c0_4 = arith.constant 0 : index
    %c0_5 = arith.constant 0 : index
    %4 = vector.load %arg4[%c0_4, %c0_5] : memref<24x128xf32, #tpu.memory_space<vmem>>, vector<24x128xf32>
    tpu.vector_store %arg4[%c0_4, %c0_5], %3 {strides = array<i32>} : memref<24x128xf32, #tpu.memory_space<vmem>>, vector<24x128xf32>,
    return
  }
  func.func @transform_0(%arg0: i32, %arg1: memref<4xi32, #tpu.memory_space<smem>>) -> (i32, i32, i32) {
    %0 = arith.index_cast %arg0 : i32 to index
    %1 = memref.load %arg1[%0] : memref<4xi32, #tpu.memory_space<smem>>
    %c0_i32 = arith.constant 0 : i32
    %c0_i32_0 = arith.constant 0 : i32
    %c0_i32_1 = arith.constant 0 : i32
    return %1, %c0_i32, %c0_i32_0 : i32, i32, i32
  }
  func.func @transform_1(%arg0: i32, %arg1: memref<4xi32, #tpu.memory_space<smem>>) -> (i32, i32) {
    %c0_i32 = arith.constant 0 : i32
    %c0_i32_0 = arith.constant 0 : i32
    return %c0_i32, %arg0 : i32, i32
  }
  func.func @transform_2(%arg0: i32, %arg1: memref<4xi32, #tpu.memory_space<smem>>) -> (i32, i32) {
    %c0_i32 = arith.constant 0 : i32
    %c0_i32_0 = arith.constant 0 : i32
    return %c0_i32, %arg0 : i32, i32
  }
}

</mosaic_0001>

<bundles_post_ra>
// kernel: tpu_custom_call.1
= control target key start
LH: loop header
LB: loop body
LE: loop exit
PB: predicated region body
PF: predicated region fallthrough
CT: control target
= control target key end

     0   :  { %s1043_s0 = inlined_call_operand.hbm [shape: s32[4], index: 0, kind: input, shape index: {}]   ;;  %s1044_s1 = inlined_call_operand.hbm [shape: f32[4,24,24], index: 1, kind: input, shape index: {}]   ;;  %s1045_s2 = inlined_call_operand.hbm [shape: f32[24,512], index: 2, kind: input, shape index: {}]   ;;  %s1046_s3 = inlined_call_operand.hbm [shape: f32[24,512], index: 3, kind: output, shape index: {}]  }
   0x1   :  { %s552_s14 = scalar_lea.hbm %s1043_s0, 16 }
   0x2   :  { %p553_p0 = scmp.ne.s32.totalorder %s1043_s0, %s552_s14  ;;  %p556_p1 = scmp.lt.u32.totalorder %s552_s14, %s1043_s0 }
   0x4   :  { %p558_p2 = pnand %p556_p1, %p553_p0 }
   0x6   :  { %561 = shalt.err (!%p558_p2)  }
   0x7   :  { %s720_s19 = smov [#allocation3]  }
   0x8   :  { %9 = dma.hbm_to_smem %s1043_s0, 16, %s720_s19, [#allocation2] }
   0x9   :  { %678 = dma.done.wait [#allocation2], 16 }
   0xa   :  { %679 = vsyncadd [#allocation2], 4294967280 }
   0xb   :  { %11 = sfence }
   0xc   :  { %12 = vsyncpa [#allocation5], 0 }
   0xd   :  { %14 = vsyncpa [#allocation5 + $0x1], 0 }
   0xe   :  { %15 = vsyncpa [#allocation8], 0 }
   0xf   :  { %17 = vsyncpa [#allocation8 + $0x1], 0 }
  0x10   :  { %18 = vsyncpa [#allocation6], 0 }
  0x11   :  { %20 = vsyncpa [#allocation6 + $0x1], 0  ;;  %s765_s22 = smov 0   ;;  %s767_s23 = smov 0  }
  0x12   :  { %s769_s24 = smov 0   ;;  %s771_s25 = smov 0  }
  0x13   :  { %s773_s26 = smov 0   ;;  %s775_s0 = smov 0  }
  0x14   :  { %s777_s27 = smov 0  }
  0x15 LB: > { %s799_s28 = sadd.s32 4294967295, %s718_s27   ;;  %s802_s29 = sadd.s32 1, %s718_s27   ;;  %s718_s27 = sphi %s777_s27, %s1077_s27   ;;  %s714_s0 = sphi %s775_s0, %s1076_s0   ;;  %s710_s26 = sphi %s773_s26, %s1075_s26   ;;  %s706_s25 = sphi %s771_s25, %s1074_s25   ;;  %s702_s24 = sphi %s769_s24, %s1073_s24   ;;  %s698_s23 = sphi %s767_s23, %s1072_s23   ;;  %s694_s22 = sphi %s765_s22, %s1071_s22  }
  0x16   : > { %s30_s30 = sld [smem:[#allocation3 + %s718_s27]]  ;;  %s35_s5 = sadd.s32 1, %s714_s0 }
  0x17   : > { %s31_s4 = sld [smem:[#allocation3 + %s802_s29]]  ;;  %p42_p3 = scmp.ne.s32.totalorder %s714_s0, %s710_s26 }
  0x18   : > { %p1049_p4 = scmp.eq.s32.totalorder %s718_s27, 0  ;;  %p48_p5 = scmp.ne.s32.totalorder %s710_s26, %s706_s25 }
  0x19   : > { %p1048_p6 = scmp.eq.s32.totalorder %s799_s28, 0  ;;  %p1047_p8 = scmp.lt.s32.totalorder %s718_s27, 4 }
  0x1a   : > { %p44_p7 = por %p1049_p4, %p42_p3  ;;  %s124_s7 = sand.u32 1, %s714_s0  }
  0x1b   : > { %p817_p9 = por %p1048_p6, %p48_p5  ;;  %s458_s9 = smul.u32 24, %s124_s7 }
  0x1c   : > { %s463_s10 = scalar_select %p44_p7, [#allocation3], [#allocation10] }
  0x1d   : > { %s1054_s6 = scalar_select %p817_p9, 1, 0 }
  0x1e   : > { %s32_s8 = ssub.s32 %s30_s30, %s31_s4  ;;  %p827_p11 = pnand %p1047_p8, %p44_p7 }
  0x1f   : > { %p33_p10 = scmp.eq.s32.totalorder %s32_s8, 0  ;;  %s1079_s10 = smov (!%p1047_p8, %s463_s10), [#allocation11] }
  0x20   : > { %s464_s13 = scalar_select %p44_p7, %s718_s27, 0 }
  0x21   : > { %s823_s11 = scalar_select %p33_p10, %s714_s0, %s35_s5  }
  0x22   : > { %s1081_s13 = smov (!%p1047_p8, %s464_s13), 0  ;;  %s128_s14 = scalar_lea.vmem [#allocation4], %s458_s9 }
  0x23   : > { %s136_s15 = sshll.u32 %s128_s14, 4  ;;  %s129_s16 = sld [smem:[%s1079_s10 + %s1081_s13]]  ;;  %s836_s15 = int_to_ptr.vmem [resolvable:$true] %s136_s15 }
  0x24   : > { %p423_p12 = scmp.ge.s32.totalorder %s718_s27, 1  ;;  %p164_p13 = scmp.lt.s32.totalorder %s718_s27, 5 }
  0x25   : > { %s418_s19 = sadd.s32 4294967294, %s718_s27   ;;  %s58_s20 = ssub.s32 %s718_s27, %s802_s29 }
  0x26   : > { %p840_p0 = pnand %p423_p12, %p164_p13  ;;  %p852_p1 = scmp.eq.s32.totalorder %s58_s20, 0 }
  0x27   : > { %s856_s5 = scalar_lea.sflag [#allocation5], %s124_s7  ;;  %p564_p3 = pneg %p827_p11 }
  0x28   : > { %s1056_s17 = scalar_select %p840_p0, 1, 0 }
  0x29   : > { %s459_s18 = smul.u32 384, %s129_s16  ;;  %s567_s13 = scalar_lea.hbm %s1044_s1, 1536 }
  0x2b   : > { %s850_s30 = scalar_lea.hbm %s1044_s1, %s459_s18 }
  0x2c   : > { %s562_s8 = scalar_lea.hbm %s850_s30, 384  ;;  %p568_p10 = scmp.lt.u32.totalorder %s850_s30, %s1044_s1 }
  0x2d   : > { %p563_p2 = scmp.ne.s32.totalorder %s850_s30, %s562_s8  ;;  %p569_p12 = scmp.lt.u32.totalorder %s567_s13, %s562_s8 }
  0x2e   : > { %p571_p8 = scmp.lt.u32.totalorder %s562_s8, %s850_s30 }
  0x2f   : > { %p565_p5 = pnand %p564_p3, %p563_p2  ;;  %p570_p13 = por %p569_p12, %p568_p10 }
  0x31   : > { %p566_p7 = pneg %p565_p5  ;;  %p572_p6 = por %p571_p8, %p570_p13 }
  0x33   : > { %p573_p4 = pnand %p572_p6, %p566_p7 }
  0x35   : > { %576 = shalt.err (!%p573_p4)
}
  0x36   : > { %s577_s7 = scalar_lea.vmem %s836_s15, 384  ;;  %s721_s18 = smov [#allocation4]  }
  0x37   : > { %p578_p2 = scmp.ne.s32.totalorder %s836_s15, %s577_s7  ;;  %s582_s20 = sshll.u32 %s721_s18, 4  ;;  %s583_s20 = int_to_ptr.vmem [resolvable:$false] %s582_s20 }
  0x38   : > { %s584_s21 = scalar_lea.vmem %s583_s20, 768  ;;  %p585_p0 = scmp.lt.s32.totalorder %s836_s15, %s583_s20 }
  0x39   : > { %p580_p5 = pnand %p578_p2, %p564_p3  ;;  %p586_p10 = scmp.lt.s32.totalorder %s584_s21, %s577_s7 }
  0x3b   : > { %p581_p9 = pneg %p580_p5  ;;  %p587_p12 = por %p586_p10, %p585_p0 }
  0x3d   : > { %p588_p8 = pnand %p587_p12, %p581_p9 }
  0x3f   : > { %591 = shalt.err (!%p588_p8)
}
  0x40   : > { %s1051_s25 = smov 128   ;;  %s1052_s8 = smov 8  }
  0x41   : > { %476 = dma.hbm_to_vmem [thread:$0]  (!%p827_p11), %s850_s30, 384, %s836_s15, %s856_s5, %s1051_s25, %s1051_s25, %s1052_s8  }
  0x42   : > { %s61_s9 = sadd.s32 1, %s702_s24  ;;  %p68_p4 = scmp.ne.s32.totalorder %s702_s24, %s698_s23 }
  0x43   : > { %s893_s10 = scalar_select %p852_p1, %s702_s24, %s61_s9  }
  0x44   : > { %p1058_p6 = scmp.eq.s32.totalorder %s718_s27, 0  ;;  %p74_p0 = scmp.ne.s32.totalorder %s698_s23, %s694_s22 }
  0x45   : > { %p98_p3 = scmp.eq.s32.totalorder %s799_s28, 3  ;;  %p104_p7 = scmp.eq.s32.totalorder %s418_s19, 3 }
  0x46   : > { %p70_p9 = por %p68_p4, %p1058_p6  ;;  %p1059_p13 = scmp.eq.s32.totalorder %s799_s28, 0 }
  0x47   : > { %s146_s12 = sand.u32 1, %s702_s24   ;;  %p909_p5 = por %p98_p3, %p68_p4 }
  0x48   : > { %p904_p2 = por %p74_p0, %p1059_p13  ;;  %p913_p11 = por %p104_p7, %p74_p0 }
  0x49   : > { %s1061_s14 = scalar_select %p909_p5, 1, 0 }
  0x4a   : > { %s1062_s15 = scalar_select %p913_p11, 1, 0 }
  0x4b   : > { %s460_s30 = smul.u32 24, %s146_s12  ;;  %s422_s4 = sshll.u32 %s718_s27, 7 }
  0x4c   : > { %p1063_p1 = scmp.lt.s32.totalorder %s718_s27, 4  ;;  %s927_s7 = scalar_lea.hbm %s1045_s2, %s422_s4 }
  0x4d   : > { %s150_s18 = scalar_lea.vmem [#allocation7], %s460_s30  ;;  %s931_s21 = scalar_lea.sflag [#allocation8], %s146_s12 }
  0x4e   : > { %p920_p10 = pnand %p1063_p1, %p70_p9  ;;  %s156_s20 = sshll.u32 %s150_s18, 4  ;;  %s929_s20 = int_to_ptr.vmem [resolvable:$true] %s156_s20 }
  0x4f   : > { %s592_s9 = scalar_lea.hbm %s927_s7, 384  ;;  %s597_s16 = scalar_lea.hbm %s1045_s2, 1536 }
  0x50   : > { %p593_p12 = scmp.ne.s32.totalorder %s927_s7, %s592_s9  ;;  %p594_p8 = pneg %p920_p10 }
  0x51   : > { %p598_p9 = scmp.lt.u32.totalorder %s927_s7, %s1045_s2  ;;  %p599_p0 = scmp.lt.u32.totalorder %s597_s16, %s592_s9 }
  0x52   : > { %p595_p4 = pnand %p594_p8, %p593_p12  ;;  %p601_p7 = scmp.lt.u32.totalorder %s592_s9, %s927_s7 }
  0x53   : > { %p600_p3 = por %p599_p0, %p598_p9 }
  0x54   : > { %p596_p6 = pneg %p595_p4 }
  0x55   : > { %p602_p13 = por %p601_p7, %p600_p3 }
  0x57   : > { %p603_p1 = pnand %p602_p13, %p596_p6 }
  0x59   : > { %606 = shalt.err (!%p603_p1)
}
  0x5a   : > { %s607_s12 = scalar_lea.vmem %s929_s20, 384  ;;  %s724_s30 = smov [#allocation7]  }
  0x5b   : > { %p608_p12 = scmp.ne.s32.totalorder %s929_s20, %s607_s12  ;;  %s612_s18 = sshll.u32 %s724_s30, 4  ;;  %s613_s18 = int_to_ptr.vmem [resolvable:$false] %s612_s18 }
  0x5c   : > { %s614_s25 = scalar_lea.vmem %s613_s18, 768  ;;  %p615_p5 = scmp.lt.s32.totalorder %s929_s20, %s613_s18 }
  0x5d   : > { %p610_p4 = pnand %p608_p12, %p594_p8  ;;  %p616_p9 = scmp.lt.s32.totalorder %s614_s25, %s607_s12 }
  0x5f   : > { %p611_p11 = pneg %p610_p4  ;;  %p617_p0 = por %p616_p9, %p615_p5 }
  0x61   : > { %p618_p3 = pnand %p617_p0, %p611_p11 }
  0x63   : > { %621 = shalt.err (!%p618_p3)
}
  0x64   : > { %s725_s8 = smov 512   ;;  %s1065_s9 = smov 8  }
  0x65   : > { %s1066_s4 = smov 128   ;;  %p1067_p8 = scmp.ne.s32.totalorder %s1056_s17, 0 }
  0x66   : > { %479 = dma.hbm_to_vmem [thread:$0]  (!%p920_p10), %s927_s7, 384, %s929_s20, %s931_s21, %s725_s8, %s1066_s4, %s1065_s9  }
  0x67   : > { %168 = sbr.rel (%p1067_p8) target bundleno = 356 (0x164), region = 28  ;;  %s170_s19 = sand.u32 (!%p1067_p8), 1, %s710_s26  }
  0x68   : > { %s461_s16 = smul.u32 (!%p1067_p8), 24, %s170_s19  ;;  %s171_s12 = scalar_lea.sflag (!%p1067_p8), [#allocation5], %s170_s19 }
  0x69   : > { %p1068_p5 = scmp.ne.s32.totalorder (!%p1067_p8), %s1054_s6, 0 }
  0x6a   : > { %s964_s30 = scalar_lea.vmem (!%p1067_p8), [#allocation4], %s461_s16 }
  0x6e   : > { %681 = dma.done.wait (%p1068_p5), %s171_s12, 384  }
  0x6f   : > { %683 = vsyncadd (%p1068_p5), %s171_s12, 4294966912  ;;  %s971_s5 = sand.u32 1, %s698_s23  }
  0x70   : > { %s462_s17 = smul.u32 24, %s971_s5  ;;  %s180_s7 = scalar_lea.sflag [#allocation8], %s971_s5 }
  0x72   : > { %s183_s20 = scalar_lea.vmem [#allocation7], %s462_s17 }
  0x73   : > { %685 = dma.done.wait (%p904_p2), %s180_s7, 384  }
  0x74   : > { %687 = vsyncadd (%p904_p2), %s180_s7, 4294966912  ;;  %v726_v0 = vmov 0.0|0.0   ;;  %vm727_vm0 = vmmov 0   ;;  %v728_v1 = vmov 0.0   ;;  %v213_v2 = vld [vmem:[%s183_s20] sm:$0xff]  ;;  %v214_v3 = vld [vmem:[%s183_s20 + $0x8] sm:$0xff] }
  0x75   : > { %454 = vmatprep.subr.bf16.mxu1 %v726_v0  ;;  %451 = vmatprep.subr.bf16.mxu0 %v726_v0  ;;  %v452_v4 = vpack.c.bf16 %v214_v3, %v213_v2  ;;  %v215_v5 = vld [vmem:[%s183_s20 + $0x10] sm:$0xff]  ;;  %v211_v6 = vld [vmem:[%s964_s30 + $0x8] sm:$0xff]  ;;  %vm216_vm1 = vcmask 195584   ;;  %v212_v8 = vld [vmem:[%s964_s30 + $0x10] sm:$0xff]  ;;  %s208_s6 = scalar_lea.vmem [#allocation9], %s462_s17  ;;  %s427_s21 = sshll.u32 %s799_s28, 7 }
  0x76   : > { %445 = vmatprep.mubr.msk.f32.mxu1 %vm727_vm0, %v728_v1  ;;  %442 = vmatprep.mubr.msk.f32.mxu0 %vm727_vm0, %v728_v1  ;;  %v210_v7 = vld [vmem:[%s964_s30] sm:$0xff]  ;;  %s322_s13 = sshll.u32 %s208_s6, 4  ;;  %s991_s8 = scalar_lea.hbm %s1046_s3, %s427_s21  ;;  %s986_s13 = int_to_ptr.vmem [resolvable:$true] %s322_s13 }
  0x77   : > { %456 = vmatpush3.bf16.msra.mxu1 %v452_v4  ;;  %453 = vmatpush3.bf16.msra.mxu0 %v452_v4  ;;  %s310_s28 = scalar_lea.sflag [#allocation6], %s971_s5  ;;  %s622_s9 = scalar_lea.vmem %s986_s13, 384 }
  0x78   : > { %455 = vmatprep.subr.mxu1 %v728_v1  ;;  %440 = vmatprep.subr.mxu0 %v728_v1  ;;  %p623_p2 = scmp.ne.s32.totalorder %s986_s13, %s622_s9  ;;  %p1069_p11 = scmp.ne.s32.totalorder %s1061_s14, 0 }
  0x79   : > { %s729_s4 = smov [#allocation9]  }
  0x7a   : > { %p624_p10 = pnand %p623_p2, %p1069_p11  ;;  %s626_s19 = sshll.u32 %s729_s4, 4  ;;  %s627_s19 = int_to_ptr.vmem [resolvable:$false] %s626_s19 }
  0x7b   : > { %457 = vmatpush3.msra.mxu1 %v215_v5  ;;  %441 = vmatpush3.msra.mxu0 %v215_v5  ;;  %s628_s16 = scalar_lea.vmem %s627_s19, 768  ;;  %p629_p7 = scmp.lt.s32.totalorder %s986_s13, %s627_s19 }
  0x7c   : > { %446 = vmatmul.mubr.msk.f32.vlgmr.msra.gmra.mrb[0].mxu1 %vm216_vm1, %v211_v6  ;;  %443 = vmatmul.mubr.msk.f32.vlgmr.msra.gmra.mrb[0].mxu0 %vm216_vm1, %v210_v7  ;;  %p625_p6 = pneg %p624_p10  ;;  %p630_p13 = scmp.lt.s32.totalorder %s628_s16, %s622_s9 }
  0x7d   : > { %448 = vmatprep.mubr.msk.f32.mxu1 %vm727_vm0, %v728_v1 }
  0x7e   : > { %p631_p1 = por %p630_p13, %p629_p7 }
  0x80   : > { %449 = vmatmul.mubr.msk.f32.gmra.mrb[2].mxu1 %vm216_vm1, %v212_v8  ;;  %p632_p12 = pnand %p631_p1, %p625_p6 }
 0x14f   : > { %v297_v9 = vpop.f32.mrb[0].mxu1  ;;  %v292_v10 = vpop.f32.mrb[0].mxu0 }
 0x150   : > { %307 = vst [vmem:[%s208_s6 + $0x8] sm:$0xff] %v297_v9  ;;  %v447_v11 = vpop.f32.mrb[1].mxu1  ;;  %306 = vst [vmem:[%s208_s6] sm:$0xff] %v292_v10  ;;  %v444_v12 = vpop.f32.mrb[1].mxu0 }
 0x153   : > { %v302_v13 = vpop.f32.mrb[2].mxu1 }
 0x154   : > { %308 = vst [vmem:[%s208_s6 + $0x10] sm:$0xff] %v302_v13  ;;  %v450_v14 = vpop.f32.mrb[3].mxu1 }
 0x155   : > { %635 = shalt.err (!%p632_p12)
}
 0x156   : > { %s636_s12 = scalar_lea.hbm %s991_s8, 384  ;;  %s640_s7 = scalar_lea.hbm %s1046_s3, 1536 }
 0x157   : > { %p637_p4 = scmp.ne.s32.totalorder %s991_s8, %s636_s12  ;;  %p641_p3 = scmp.lt.u32.totalorder %s991_s8, %s1046_s3 }
 0x158   : > { %p642_p8 = scmp.lt.u32.totalorder %s640_s7, %s636_s12  ;;  %p644_p2 = scmp.lt.u32.totalorder %s636_s12, %s991_s8 }
 0x159   : > { %p638_p9 = pnand %p637_p4, %p1069_p11 }
 0x15a   : > { %p643_p5 = por %p642_p8, %p641_p3 }
 0x15b   : > { %p639_p0 = pneg %p638_p9 }
 0x15c   : > { %p645_p10 = por %p644_p2, %p643_p5 }
 0x15e   : > { %p646_p6 = pnand %p645_p10, %p639_p0 }
 0x160   : > { %649 = shalt.err (!%p646_p6)
}
 0x161   : > { %s730_s21 = smov 128   ;;  %s731_s18 = smov 512  }
 0x162   : > { %s732_s25 = smov 8  }
 0x163   : > { %469 = dma.vmem_to_hbm [thread:$0]  (%p1069_p11), %s986_s13, 384, %s991_s8, %s310_s28, %s730_s21, %s731_s18, %s732_s25  }
 0x164 PF: > { %p485_p7 = scmp.ge.s32.totalorder %s718_s27, 2  ;;  %s337_s9 = sand.u32 1, %s694_s22  }
 0x165   : > { %p1070_p13 = scmp.ne.s32.totalorder %s1062_s15, 0  ;;  %s338_s4 = scalar_lea.sflag [#allocation6], %s337_s9 }
 0x167   : > { %p481_p1 = pnand %p485_p7, %p1070_p13 }
 0x169   : > { %689 = dma.done.wait (!%p481_p1), %s338_s4, 384  }
 0x16a   : > { %691 = vsyncadd (!%p481_p1), %s338_s4, 4294966912  ;;  %p23_p11 = scmp.ge.s32.totalorder %s802_s29, 6   ;;  %s1071_s22 = smov %s698_s23 }
 0x16b   : > { %s1072_s23 = smov %s702_s24  ;;  %s1073_s24 = smov %s893_s10 }
 0x16c   : > { %s1074_s25 = smov %s710_s26  ;;  %s1075_s26 = smov %s714_s0 }
 0x16d   : > { %s1076_s0 = smov %s823_s11  ;;  %s1077_s27 = smov %s802_s29 }
 0x16e   :  { %25 = sbr.rel (!%p23_p11) target bundleno = 21 (0x15), region = 86 }
 0x175   :  { %343 = vsyncpa [#allocation5], 1 }
 0x176   :  { %345 = vsyncpa [#allocation5 + $0x1], 1 }
 0x177   :  { %346 = vsyncpa [#allocation8], 1 }
 0x178   :  { %348 = vsyncpa [#allocation8 + $0x1], 1 }
 0x179   :  { %349 = vsyncpa [#allocation6], 1 }
 0x17a   :  { %351 = vsyncpa [#allocation6 + $0x1], 1 }

</bundles_post_ra>
